<compile_context>
chip_gen: v7x
topology: tpu7x:2x2x1
jax: 0.10.0
libtpu: 0.0.40
codegen_flags: <defaults>
</compile_context>

<pallas_src>
import functools
import math

import jax
import jax.numpy as jnp
from jax.experimental import pallas as pl
from jax.experimental.pallas import tpu as pltpu

_LANES = 1024          # lane-dense last dim (8 * 128) -> wide unmasked vst
_TM = 512              # rows per tile: 512*1024*4B = 2 MiB per f32 block

# lowbias32 hash constants (as signed int32 so they fit jnp's int32 weak type).
_C1 = 0x7FEB352D                 # 2142123341
_C2 = -2073254261                # 0x846CA68B reinterpreted as int32
_MASK31 = 0x7FFFFFFF


def _lowbias32(x):
    """32-bit integer avalanche hash, done entirely in (wrapping) int32 ops."""
    shape = x.shape
    s16 = jnp.full(shape, 16, jnp.int32)
    s15 = jnp.full(shape, 15, jnp.int32)
    x = x ^ jax.lax.shift_right_logical(x, s16)
    x = x * _C1
    x = x ^ jax.lax.shift_right_logical(x, s15)
    x = x * _C2
    x = x ^ jax.lax.shift_right_logical(x, s16)
    return x


def _layres_add_kernel(inp_ref, byp_ref, out_ref):
    """dropout == 0 path: pure elementwise residual add."""
    out_ref[...] = inp_ref[...] + byp_ref[...]


def _layres_dropout_kernel(seed_ref, inp_ref, byp_ref, out_ref, *, dropout: float):
    """dropout > 0 path: inp + inverted_dropout(bypass).

    Mask = hash(global_element_index ^ seed) compared against an integer
    threshold, so the result is deterministic for a given seed regardless of
    tiling or which TensorCore executes the block.
    """
    tm, lanes = byp_ref.shape
    tile = pl.program_id(0)

    row = jax.lax.broadcasted_iota(jnp.int32, (tm, lanes), 0)
    col = jax.lax.broadcasted_iota(jnp.int32, (tm, lanes), 1)
    gidx = (row + tile * tm) * lanes + col          # global element index (wraps in int32)

    bits = _lowbias32(gidx ^ seed_ref[0])
    r = bits & _MASK31                               # uniform in [0, 2^31)
    threshold = int(dropout * float(1 << 31))        # keep prob = 1 - dropout
    keep = r >= threshold

    scale = 1.0 / (1.0 - dropout)                    # inverted-dropout scaling
    b = byp_ref[...]
    b = jnp.where(keep, b * scale, jnp.zeros_like(b))
    out_ref[...] = inp_ref[...] + b


def _round_up(n: int, m: int) -> int:
    return ((n + m - 1) // m) * m


def layres_forward(inp: jax.Array, bypass: jax.Array, *, dropout: float = 0.0,
                   seed: int = 0) -> jax.Array:
    """Pallas implementation of LayRES.forward(inp, bypass)."""
    assert inp.shape == bypass.shape, "inp and bypass must have equal shapes"
    assert 0.0 <= dropout < 1.0, "dropout must be in [0, 1)"
    if bypass.dtype != inp.dtype:
        bypass = bypass.astype(inp.dtype)

    orig_shape = inp.shape
    total = math.prod(orig_shape) if orig_shape else 1

    x = inp.reshape(-1)
    b = bypass.reshape(-1)

    # Pad only up to the lane width (<= 1023 elems); the row axis may be ragged
    # and Pallas masks the final block's stores.
    padded = _round_up(total, _LANES)
    if padded != total:
        x = jnp.pad(x, (0, padded - total))
        b = jnp.pad(b, (0, padded - total))
    rows = padded // _LANES
    tm = min(_TM, rows)          # tm == rows (full dim) for small inputs
    grid = (pl.cdiv(rows, tm),)
    blk = (tm, _LANES)

    x2 = x.reshape(rows, _LANES)
    b2 = b.reshape(rows, _LANES)

    compiler_params = pltpu.CompilerParams(
        dimension_semantics=("parallel",),           # megacore split on v7x
        vmem_limit_bytes=32 * 1024 * 1024,           # headroom; 3 x 2 x 2 MiB used
    )
    out_shape = jax.ShapeDtypeStruct((rows, _LANES), inp.dtype)

    if dropout > 0.0:
        seed_arr = jnp.asarray([seed], dtype=jnp.int32)
        kernel = functools.partial(_layres_dropout_kernel, dropout=float(dropout))
        out2 = pl.pallas_call(
            kernel,
            out_shape=out_shape,
            grid_spec=pltpu.PrefetchScalarGridSpec(
                num_scalar_prefetch=1,
                grid=grid,
                in_specs=[
                    pl.BlockSpec(blk, lambda i, seed_ref: (i, 0)),
                    pl.BlockSpec(blk, lambda i, seed_ref: (i, 0)),
                ],
                out_specs=pl.BlockSpec(blk, lambda i, seed_ref: (i, 0)),
            ),
            compiler_params=compiler_params,
        )(seed_arr, x2, b2)
    else:
        out2 = pl.pallas_call(
            _layres_add_kernel,
            out_shape=out_shape,
            grid=grid,
            in_specs=[
                pl.BlockSpec(blk, lambda i: (i, 0)),
                pl.BlockSpec(blk, lambda i: (i, 0)),
            ],
            out_specs=pl.BlockSpec(blk, lambda i: (i, 0)),
            compiler_params=compiler_params,
        )(x2, b2)

    out = out2.reshape(-1)
    if padded != total:
        out = out[:total]
    return out.reshape(orig_shape)


if __name__ == "__main__":
    key = jax.random.PRNGKey(0)
    k1, k2, k3, k4 = jax.random.split(key, 4)

    # --- Small NCHW residual feature map (2, 4, 16, 16) ---------------------
    x = jax.random.normal(k1, (2, 4, 16, 16), dtype=jnp.float32)
    byp = jax.random.normal(k2, (2, 4, 16, 16), dtype=jnp.float32)

    # dropout = 0.0 (default LayRES): must match inp + bypass exactly.
    out = jax.block_until_ready(layres_forward(x, byp, dropout=0.0))
    ref = x + byp
    assert out.shape == x.shape and out.dtype == x.dtype
    assert bool(jnp.allclose(out, ref, atol=1e-6, rtol=1e-6)), "dropout=0 mismatch"

    # dropout > 0: every output element is either inp (dropped) or
    # inp + bypass/(1-p) (kept), and the keep rate is ~ (1-p).
    p = 0.5
    out_d = jax.block_until_ready(layres_forward(x, byp, dropout=p, seed=1234))
    diff = out_d - x
    scaled = byp / (1.0 - p)
    kept = jnp.isclose(diff, scaled, atol=1e-5, rtol=1e-5)
    ok = jnp.logical_or(jnp.isclose(diff, 0.0, atol=1e-5), kept)
    assert bool(jnp.all(ok)), "dropout>0 semantics mismatch"
    keep_frac = float(jnp.mean(kept.astype(jnp.float32)))
    assert 0.3 < keep_frac < 0.7, f"keep fraction {keep_frac} far from 1-p"

    # --- Larger shape exercising the multi-tile grid + ragged last block ----
    xl = jax.random.normal(k3, (2, 16, 128, 129), dtype=jnp.float32)   # 528384 elems
    bl = jax.random.normal(k4, (2, 16, 128, 129), dtype=jnp.float32)

    out_l = jax.block_until_ready(layres_forward(xl, bl, dropout=0.0))
    assert bool(jnp.allclose(out_l, xl + bl, atol=1e-6, rtol=1e-6)), "tiled add mismatch"

    p2 = 0.25
    out_ld = jax.block_until_ready(layres_forward(xl, bl, dropout=p2, seed=7))
    diff_l = out_ld - xl
    scaled_l = bl / (1.0 - p2)
    kept_l = jnp.isclose(diff_l, scaled_l, atol=1e-5, rtol=1e-5)
    ok_l = jnp.logical_or(jnp.isclose(diff_l, 0.0, atol=1e-5), kept_l)
    assert bool(jnp.all(ok_l)), "tiled dropout semantics mismatch"
    keep_frac_l = float(jnp.mean(kept_l.astype(jnp.float32)))
    assert 0.70 < keep_frac_l < 0.80, f"tiled keep fraction {keep_frac_l} far from 1-p"

    print("KERNEL_OK")
</pallas_src>

<mosaic_0001>
module attributes {stable_mosaic.version = 11 : i64} {
  func.func @_layres_add_kernel(%arg0: i32, %arg1: memref<2x1024xf32, #tpu.memory_space<vmem>>, %arg2: memref<2x1024xf32, #tpu.memory_space<vmem>>, %arg3: memref<2x1024xf32, #tpu.memory_space<vmem>>) attributes {dimension_semantics = [#tpu.dimension_semantics<parallel>], iteration_bounds = array<i64: 1>, scalar_prefetch = 0 : i64, scratch_operands = 0 : i64, tpu.core_type = #tpu.core_type<tc>, window_params = [{transform_indices = @transform_0, window_bounds = array<i64: 2, 1024>}, {transform_indices = @transform_1, window_bounds = array<i64: 2, 1024>}, {transform_indices = @transform_2, window_bounds = array<i64: 2, 1024>}]} {
    %c0 = arith.constant 0 : index
    %c0_0 = arith.constant 0 : index
    %0 = vector.load %arg1[%c0, %c0_0] : memref<2x1024xf32, #tpu.memory_space<vmem>>, vector<2x1024xf32>
    %c0_1 = arith.constant 0 : index
    %c0_2 = arith.constant 0 : index
    %1 = vector.load %arg2[%c0_1, %c0_2] : memref<2x1024xf32, #tpu.memory_space<vmem>>, vector<2x1024xf32>
    %2 = arith.addf %0, %1 : vector<2x1024xf32>
    %c0_3 = arith.constant 0 : index
    %c0_4 = arith.constant 0 : index
    %3 = vector.load %arg3[%c0_3, %c0_4] : memref<2x1024xf32, #tpu.memory_space<vmem>>, vector<2x1024xf32>
    tpu.vector_store %arg3[%c0_3, %c0_4], %2 {strides = array<i32>} : memref<2x1024xf32, #tpu.memory_space<vmem>>, vector<2x1024xf32>,
    return
  }
  func.func @transform_0(%arg0: i32) -> (i32, i32) {
    %c0_i32 = arith.constant 0 : i32
    %c0_i32_0 = arith.constant 0 : i32
    return %arg0, %c0_i32 : i32, i32
  }
  func.func @transform_1(%arg0: i32) -> (i32, i32) {
    %c0_i32 = arith.constant 0 : i32
    %c0_i32_0 = arith.constant 0 : i32
    return %arg0, %c0_i32 : i32, i32
  }
  func.func @transform_2(%arg0: i32) -> (i32, i32) {
    %c0_i32 = arith.constant 0 : i32
    %c0_i32_0 = arith.constant 0 : i32
    return %arg0, %c0_i32 : i32, i32
  }
}

</mosaic_0001>

<bundles_post_ra>
// kernel: tpu_custom_call.1
= control target key start
LH: loop header
LB: loop body
LE: loop exit
PB: predicated region body
PF: predicated region fallthrough
CT: control target
= control target key end

     0   :  { %7 = vsyncpa [#allocation3], 0  ;;  %s189_s0 = inlined_call_operand.hbm [shape: f32[2,1024], index: 0, kind: input, shape index: {}]   ;;  %s190_s1 = inlined_call_operand.hbm [shape: f32[2,1024], index: 1, kind: input, shape index: {}]   ;;  %s191_s2 = inlined_call_operand.hbm [shape: f32[2,1024], index: 2, kind: output, shape index: {}]  }
   0x1   :  { %8 = vsyncpa [#allocation6], 0 }
   0x2   :  { %9 = vsyncpa [#allocation4], 0  ;;  %s135_s9 = smov [#allocation2]   ;;  %s136_s11 = smov [#allocation5]  }
   0x3   :  { %s16_s10 = sshll.u32 %s135_s9, 4  ;;  %s26_s12 = sshll.u32 %s136_s11, 4  ;;  %s17_s10 = int_to_ptr.vmem [resolvable:$true] %s16_s10  ;;  %s27_s12 = int_to_ptr.vmem [resolvable:$true] %s26_s12 }
   0x4   :  { %s63_s15 = scalar_lea.hbm %s189_s0, 256 }
   0x5   :  { %p64_p0 = scmp.ne.s32.totalorder %s189_s0, %s63_s15  ;;  %p67_p1 = scmp.lt.u32.totalorder %s63_s15, %s189_s0 }
   0x7   :  { %p69_p2 = pnand %p67_p1, %p64_p0 }
   0x9   :  { %72 = shalt.err (!%p69_p2)
}
   0xa   :  { %s73_s20 = scalar_lea.vmem %s17_s10, 256  ;;  %p78_p4 = scmp.lt.s32.totalorder %s17_s10, %s17_s10 }
   0xb   :  { %p74_p3 = scmp.ne.s32.totalorder %s17_s10, %s73_s20  ;;  %p79_p5 = scmp.lt.s32.totalorder %s73_s20, %s73_s20 }
   0xd   :  { %p80_p6 = por %p79_p5, %p78_p4 }
   0xf   :  { %p81_p7 = pnand %p80_p6, %p74_p3 }
  0x11   :  { %84 = shalt.err (!%p81_p7)
}
  0x12   :  { %19 = dma.hbm_to_vmem [thread:$0]  %s189_s0, 256, %s17_s10, [#allocation3]  }
  0x13   :  { %s85_s25 = scalar_lea.hbm %s190_s1, 256 }
  0x14   :  { %p86_p8 = scmp.ne.s32.totalorder %s190_s1, %s85_s25  ;;  %p89_p9 = scmp.lt.u32.totalorder %s85_s25, %s190_s1 }
  0x16   :  { %p91_p10 = pnand %p89_p9, %p86_p8 }
  0x18   :  { %94 = shalt.err (!%p91_p10)
}
  0x19   :  { %s95_s30 = scalar_lea.vmem %s27_s12, 256  ;;  %p100_p12 = scmp.lt.s32.totalorder %s27_s12, %s27_s12 }
  0x1a   :  { %p96_p11 = scmp.ne.s32.totalorder %s27_s12, %s95_s30  ;;  %p101_p13 = scmp.lt.s32.totalorder %s95_s30, %s95_s30 }
  0x1c   :  { %p102_p0 = por %p101_p13, %p100_p12 }
  0x1e   :  { %p103_p1 = pnand %p102_p0, %p96_p11 }
  0x20   :  { %106 = shalt.err (!%p103_p1)
}
  0x21   :  { %29 = dma.hbm_to_vmem [thread:$0]  %s190_s1, 256, %s27_s12, [#allocation6]  }
  0x22   :  { %129 = dma.done.wait [#allocation3], 256  }
  0x23   :  { %130 = vsyncadd [#allocation3], 4294967040 }
  0x24   :  { %131 = dma.done.wait [#allocation6], 256  }
  0x25   :  { %132 = vsyncadd [#allocation6], 4294967040  ;;  %s137_s4 = smov [#allocation7]   ;;  %v36_v0 = vld [vmem:[#allocation2] sm:$0xff]  ;;  %v38_v1 = vld [vmem:[#allocation5] sm:$0xff] }
  0x26   :  { %s50_s5 = sshll.u32 %s137_s4, 4  ;;  %v37_v2 = vld [vmem:[#allocation2 + $0x8] sm:$0xff]  ;;  %v40_v3 = vadd.f32 %v38_v1, %v36_v0  ;;  %v39_v4 = vld [vmem:[#allocation5 + $0x8] sm:$0xff]  ;;  %s51_s5 = int_to_ptr.vmem [resolvable:$true] %s50_s5 }
  0x27   :  { %v41_v5 = vadd.f32 %v39_v4, %v37_v2  ;;  %s107_s6 = scalar_lea.vmem %s51_s5, 256  ;;  %p112_p3 = scmp.lt.s32.totalorder %s51_s5, %s51_s5 }
  0x28   :  { %42 = vst [vmem:[#allocation7] sm:$0xff] %v40_v3  ;;  %p108_p2 = scmp.ne.s32.totalorder %s51_s5, %s107_s6  ;;  %p113_p4 = scmp.lt.s32.totalorder %s107_s6, %s107_s6 }
  0x29   :  { %43 = vst [vmem:[#allocation7 + $0x8] sm:$0xff] %v41_v5 }
  0x2a   :  { %p114_p5 = por %p113_p4, %p112_p3 }
  0x2c   :  { %p115_p6 = pnand %p114_p5, %p108_p2 }
  0x2e   :  { %118 = shalt.err (!%p115_p6)
}
  0x2f   :  { %s119_s8 = scalar_lea.hbm %s191_s2, 256 }
  0x30   :  { %p120_p7 = scmp.ne.s32.totalorder %s191_s2, %s119_s8  ;;  %p123_p8 = scmp.lt.u32.totalorder %s119_s8, %s191_s2 }
  0x32   :  { %p125_p9 = pnand %p123_p8, %p120_p7 }
  0x34   :  { %128 = shalt.err (!%p125_p9)
}
  0x35   :  { %53 = dma.vmem_to_hbm [thread:$0]  %s51_s5, 256, %s191_s2, [#allocation4]  }
  0x36   :  { %133 = dma.done.wait [#allocation4], 256  }
  0x37   :  { %134 = vsyncadd [#allocation4], 4294967040 }
  0x38   :  { %57 = vsyncpa [#allocation3], 1 }
  0x39   :  { %58 = vsyncpa [#allocation6], 1 }
  0x3a   :  { %59 = vsyncpa [#allocation4], 1 }

</bundles_post_ra>
